<compile_context>
chip_gen: v5e
topology: v5e:2x2
jax: 0.10.0
libtpu: 0.0.40
codegen_flags: <defaults>
</compile_context>

<pallas_src>
import jax
import jax.numpy as jnp
from jax.experimental import pallas as pl
from jax.experimental.pallas import tpu as pltpu


# ----------------------------------------------------------------------------
# Fused Pallas kernel: chosen-model forward  o = x @ W[idx] + b[idx]
# ----------------------------------------------------------------------------
def _select_linear_kernel(idx_ref, x_ref, w_ref, b_ref, o_ref):
    # idx_ref lives in SMEM (scalar prefetch) and is consumed by the
    # index_maps; the body only ever sees the already-selected (D, H) block.
    del idx_ref
    o_ref[...] = (
        jnp.dot(x_ref[...], w_ref[...], preferred_element_type=jnp.float32)
        + b_ref[...]
    )


def _row_tile(t):
    for tm in (512, 256, 128, 64, 32, 16, 8):
        if t % tm == 0:
            return tm
    return t  # small / odd T -> single full-extent block


def ensemble_select_forward(idx, feats, Ws, bs):
    """Run the idx-th sub-model's forward: feats @ Ws[idx] + bs[idx].

    idx:   (1,) int32     -- scalar-prefetched routing decision
    feats: (T, D) f32     -- cast to bf16 at the kernel boundary
    Ws:    (M, D, H)      -- pre-stacked weights (only block idx is DMA'd)
    bs:    (M, H) f32     -- bias stays f32, added after f32 accumulation
    Returns (T, H) f32.
    """
    T, D = feats.shape
    M, D2, H = Ws.shape
    assert D2 == D and bs.shape == (M, H)
    # Lane-dense layout: keep contraction and output dims multiples of 128.
    assert D % 128 == 0 and H % 128 == 0, "pad D/H to a multiple of 128"

    tm = _row_tile(T)
    grid = (T // tm,)

    feats_b = feats.astype(jnp.bfloat16)
    Ws_b = Ws.astype(jnp.bfloat16)
    bs_3d = bs.astype(jnp.float32).reshape(M, 1, H)

    return pl.pallas_call(
        _select_linear_kernel,
        out_shape=jax.ShapeDtypeStruct((T, H), jnp.float32),
        grid_spec=pltpu.PrefetchScalarGridSpec(
            num_scalar_prefetch=1,
            grid=grid,
            in_specs=[
                pl.BlockSpec((tm, D), lambda i, idx_ref: (i, 0)),
                pl.BlockSpec((None, D, H), lambda i, idx_ref: (idx_ref[0], 0, 0)),
                pl.BlockSpec((None, 1, H), lambda i, idx_ref: (idx_ref[0], 0, 0)),
            ],
            out_specs=pl.BlockSpec((tm, H), lambda i, idx_ref: (i, 0)),
        ),
        compiler_params=pltpu.CompilerParams(
            dimension_semantics=("parallel",),  # row tiles shard across TCs on v7x
        ),
    )(idx, feats_b, Ws_b, bs_3d)


# ----------------------------------------------------------------------------
# EnsembleModels (JAX side): sub-models + policy routing
# ----------------------------------------------------------------------------
class SubModel:
    """Synthetic stand-in for the opaque PyTorch sub-models: linear classifier."""

    def __init__(self, W, b, can_process_fn, name):
        self.W = W
        self.b = b
        self._can = can_process_fn
        self.name = name

    def can_process_mask(self, token_ids, token_lens):
        # vectorized canProcess over tokens -> (T,) float32 {0,1}
        return self._can(token_ids, token_lens).astype(jnp.float32)

    def __call__(self, feats):
        return ensemble_select_forward(
            jnp.zeros((1,), jnp.int32), feats, self.W[None], self.b[None]
        )


class EnsembleModels:
    def __init__(self, model_and_score, policy, word_based, char_based,
                 word_attention_based, char_attention_based):
        self.name = "EnsembleModels"
        self.model_and_score = model_and_score
        self.policy = policy
        self.word_based = word_based
        self.char_based = char_based
        self.word_attention_based = word_attention_based
        self.char_attention_based = char_attention_based
        # Pre-stack parameters once; the fused kernel indexes them directly
        # (no per-call jnp.stack + jnp.take gather of all models' weights).
        self._Ws = jnp.stack([m.W for m, _ in model_and_score])       # (M, D, H)
        self._bs = jnp.stack([m.b for m, _ in model_and_score])       # (M, H)
        self._scores = jnp.array([s for _, s in model_and_score], jnp.float32)
        self._experts = [word_attention_based, word_based,
                         char_attention_based, char_based]
        self._expert_Ws = jnp.stack([m.W for m in self._experts])
        self._expert_bs = jnp.stack([m.b for m in self._experts])

    # --- mixture_of_experts routing -----------------------------------------
    def _mixture_of_experts(self, token_ids, token_lens, feats):
        word_num_threshold = 10
        char_num_threshold = 50
        word_embedding_ratio = 0.9
        num_char = jnp.sum(token_lens)
        num_word_embedding = jnp.sum(
            self.word_based.can_process_mask(token_ids, token_lens)
        )
        total_num_words = token_ids.shape[0]
        # TODO(synk): the reference prints which expert was chosen; skipped (I/O only).
        idx = jnp.where(
            num_word_embedding > total_num_words * word_embedding_ratio,
            jnp.where(total_num_words > word_num_threshold, 0, 1),
            jnp.where(num_char > char_num_threshold, 2, 3),
        ).astype(jnp.int32).reshape(1)
        return ensemble_select_forward(idx, feats, self._expert_Ws, self._expert_bs)

    # --- forward -------------------------------------------------------------
    def forward(self, token_ids, token_lens, feats):
        if self.policy == "mixture_of_experts":
            return self._mixture_of_experts(token_ids, token_lens, feats)
        # weights[i] += score_i for every token the model canProcess; then /= sum.
        # ~32 FLOPs -> keep in XLA; a dedicated kernel launch would dwarf the work.
        # (NaN weights when sum == 0 matches the torch semantics.)
        mask = jnp.stack([m.can_process_mask(token_ids, token_lens)
                          for m, _ in self.model_and_score])           # (M, T)
        raw = self._scores * jnp.sum(mask, axis=1)                     # (M,)
        weights = raw / jnp.sum(raw)
        if self.policy == "highest_weights":
            idx = jnp.argmax(weights).astype(jnp.int32).reshape(1)
            return ensemble_select_forward(idx, feats, self._Ws, self._bs)
        # 'majority' / 'average' are `pass` in the reference (undefined output).
        return None

    __call__ = forward


# ----------------------------------------------------------------------------
# main
# ----------------------------------------------------------------------------
if __name__ == "__main__":
    key = jax.random.PRNGKey(0)
    T, D, H = 8, 128, 128   # tokens, feature dim, hidden dim (lane-dense 128)
    VOCAB = 100

    k_id, k_len, k_feat, k_w, k_b = jax.random.split(key, 5)
    token_ids = jax.random.randint(k_id, (T,), -1, VOCAB)      # -1 == OOV
    token_lens = jax.random.randint(k_len, (T,), 1, 12)
    feats = jax.random.normal(k_feat, (T, D), dtype=jnp.float32)

    # Deterministic sub-model parameters (4 models).
    Ws = jax.random.normal(k_w, (4, D, H), dtype=jnp.float32) * 0.1
    bs = jax.random.normal(k_b, (4, H), dtype=jnp.float32) * 0.1

    word_based = SubModel(Ws[0], bs[0],
                          lambda ids, lens: ids >= 0, "word_based")
    char_based = SubModel(Ws[1], bs[1],
                          lambda ids, lens: jnp.ones_like(ids, bool), "char_based")
    word_attention_based = SubModel(Ws[2], bs[2],
                                    lambda ids, lens: ids >= 0, "word_attention_based")
    char_attention_based = SubModel(Ws[3], bs[3],
                                    lambda ids, lens: lens > 0, "char_attention_based")

    model_and_score = [
        (word_based, 1.0),
        (char_based, 0.5),
        (word_attention_based, 2.0),
        (char_attention_based, 0.8),
    ]

    # ---- highest_weights policy --------------------------------------------
    ens = EnsembleModels(model_and_score, "highest_weights", word_based, char_based,
                         word_attention_based, char_attention_based)
    out = jax.block_until_ready(ens(token_ids, token_lens, feats))

    # Pure-JAX reference (same bf16-input / f32-accumulate arithmetic).
    mask_ref = jnp.stack([m.can_process_mask(token_ids, token_lens)
                          for m, _ in model_and_score])
    scores_ref = jnp.array([s for _, s in model_and_score], jnp.float32)
    w_raw = scores_ref * jnp.sum(mask_ref, axis=1)
    w_ref = w_raw / jnp.sum(w_raw)
    idx_hw = int(jnp.argmax(w_ref))
    feats_bf = feats.astype(jnp.bfloat16).astype(jnp.float32)
    Ws_bf = Ws.astype(jnp.bfloat16).astype(jnp.float32)
    expected_hw = feats_bf @ Ws_bf[idx_hw] + bs[idx_hw]
    assert out.shape == (T, H)
    assert jnp.allclose(out, expected_hw, atol=1e-3, rtol=1e-3)

    # ---- mixture_of_experts policy (reuses the same fused kernel) -----------
    ens_moe = EnsembleModels(model_and_score, "mixture_of_experts", word_based,
                             char_based, word_attention_based, char_attention_based)
    out_moe = jax.block_until_ready(ens_moe(token_ids, token_lens, feats))

    num_char = int(jnp.sum(token_lens))
    num_we = int(jnp.sum(word_based.can_process_mask(token_ids, token_lens)))
    if num_we > T * 0.9:
        idx_moe = 0 if T > 10 else 1
    elif num_char > 50:
        idx_moe = 2
    else:
        idx_moe = 3
    experts = [word_attention_based, word_based, char_attention_based, char_based]
    W_sel = experts[idx_moe].W.astype(jnp.bfloat16).astype(jnp.float32)
    expected_moe = feats_bf @ W_sel + experts[idx_moe].b
    assert jnp.allclose(out_moe, expected_moe, atol=1e-3, rtol=1e-3)

    print("KERNEL_OK")
</pallas_src>

<mosaic_0001>
module attributes {stable_mosaic.version = 11 : i64} {
  func.func @_select_linear_kernel(%arg0: i32, %arg1: memref<1xi32, #tpu.memory_space<smem>>, %arg2: memref<8x128xbf16, #tpu.memory_space<vmem>>, %arg3: memref<1x128x128xbf16, #tpu.memory_space<vmem>>, %arg4: memref<1x1x128xf32, #tpu.memory_space<vmem>>, %arg5: memref<8x128xf32, #tpu.memory_space<vmem>>) attributes {dimension_semantics = [#tpu.dimension_semantics<parallel>], iteration_bounds = array<i64: 1>, scalar_prefetch = 1 : i64, scratch_operands = 0 : i64, tpu.core_type = #tpu.core_type<tc>, window_params = [{transform_indices = @transform_0, window_bounds = array<i64: 8, 128>}, {transform_indices = @transform_1, window_bounds = array<i64: 1, 128, 128>}, {transform_indices = @transform_2, window_bounds = array<i64: 1, 1, 128>}, {transform_indices = @transform_3, window_bounds = array<i64: 8, 128>}]} {
    %c0 = arith.constant 0 : index
    %c0_0 = arith.constant 0 : index
    %0 = vector.load %arg2[%c0, %c0_0] : memref<8x128xbf16, #tpu.memory_space<vmem>>, vector<8x128xbf16>
    %c0_1 = arith.constant 0 : index
    %c0_2 = arith.constant 0 : index
    %c0_3 = arith.constant 0 : index
    %1 = vector.load %arg3[%c0_1, %c0_2, %c0_3] : memref<1x128x128xbf16, #tpu.memory_space<vmem>>, vector<1x128x128xbf16>
    %2 = vector.shape_cast %1 : vector<1x128x128xbf16> to vector<128x128xbf16>
    %cst = arith.constant dense<0.000000e+00> : vector<8x128xf32>
    %3 = tpu.matmul %0, %2, %cst {dimension_numbers = #tpu.dot_dimension_numbers<[1], [0], [0], [1], [0, 0, 1, 1], [], []>} : vector<8x128xbf16>, vector<128x128xbf16>, vector<8x128xf32> -> vector<8x128xf32>
    %c0_4 = arith.constant 0 : index
    %c0_5 = arith.constant 0 : index
    %c0_6 = arith.constant 0 : index
    %4 = vector.load %arg4[%c0_4, %c0_5, %c0_6] : memref<1x1x128xf32, #tpu.memory_space<vmem>>, vector<1x1x128xf32>
    %5 = vector.shape_cast %4 : vector<1x1x128xf32> to vector<1x128xf32>
    %6 = vector.broadcast %5 : vector<1x128xf32> to vector<8x128xf32>
    %7 = arith.addf %3, %6 : vector<8x128xf32>
    %c0_7 = arith.constant 0 : index
    %c0_8 = arith.constant 0 : index
    %8 = vector.load %arg5[%c0_7, %c0_8] : memref<8x128xf32, #tpu.memory_space<vmem>>, vector<8x128xf32>
    tpu.vector_store %arg5[%c0_7, %c0_8], %7 {strides = array<i32>} : memref<8x128xf32, #tpu.memory_space<vmem>>, vector<8x128xf32>,
    return
  }
  func.func @transform_0(%arg0: i32, %arg1: memref<1xi32, #tpu.memory_space<smem>>) -> (i32, i32) {
    %c0_i32 = arith.constant 0 : i32
    %c0_i32_0 = arith.constant 0 : i32
    return %arg0, %c0_i32 : i32, i32
  }
  func.func @transform_1(%arg0: i32, %arg1: memref<1xi32, #tpu.memory_space<smem>>) -> (i32, i32, i32) {
    %c0 = arith.constant 0 : index
    %0 = memref.load %arg1[%c0] : memref<1xi32, #tpu.memory_space<smem>>
    %c0_i32 = arith.constant 0 : i32
    %c0_i32_0 = arith.constant 0 : i32
    %c0_i32_1 = arith.constant 0 : i32
    return %0, %c0_i32, %c0_i32_0 : i32, i32, i32
  }
  func.func @transform_2(%arg0: i32, %arg1: memref<1xi32, #tpu.memory_space<smem>>) -> (i32, i32, i32) {
    %c0 = arith.constant 0 : index
    %0 = memref.load %arg1[%c0] : memref<1xi32, #tpu.memory_space<smem>>
    %c0_i32 = arith.constant 0 : i32
    %c0_i32_0 = arith.constant 0 : i32
    %c0_i32_1 = arith.constant 0 : i32
    return %0, %c0_i32, %c0_i32_0 : i32, i32, i32
  }
  func.func @transform_3(%arg0: i32, %arg1: memref<1xi32, #tpu.memory_space<smem>>) -> (i32, i32) {
    %c0_i32 = arith.constant 0 : i32
    %c0_i32_0 = arith.constant 0 : i32
    return %arg0, %c0_i32 : i32, i32
  }
}

</mosaic_0001>

<bundles_post_ra>
// kernel: tpu_custom_call.1
= control target key start
LH: loop header
LB: loop body
LE: loop exit
PB: predicated region body
PF: predicated region fallthrough
CT: control target
= control target key end

     0   :  { %10 = vsyncpa [#allocation5], 0  ;;  %s385_s0 = inlined_call_operand.<no memory space> [shape: s32[1], index: 0, kind: input, shape index: {}]   ;;  %s386_s1 = inlined_call_operand.hbm [shape: bf16[8,128], index: 1, kind: input, shape index: {}]   ;;  %s387_s2 = inlined_call_operand.hbm [shape: bf16[4,128,128], index: 2, kind: input, shape index: {}]   ;;  %s388_s3 = inlined_call_operand.hbm [shape: f32[4,1,128], index: 3, kind: input, shape index: {}]   ;;  %s389_s4 = inlined_call_operand.hbm [shape: f32[8,128], index: 4, kind: output, shape index: {}]  }
   0x1   :  { %11 = vsyncpa [#allocation8], 0  ;;  %s206_s17 = sshll.u32 %s385_s0, 6 }
   0x2   :  { %12 = vsyncpa [#allocation6], 0  ;;  %s31_s20 = scalar_lea.hbm %s387_s2, %s206_s17  ;;  %s324_s21 = smov [#allocation7]  }
   0x3   :  { %s34_s22 = sshll.u32 %s324_s21, 4  ;;  %s32_s23 = sshll.u32 %s31_s20, 4  ;;  %s35_s22 = int_to_ptr.vmem [resolvable:$true] %s34_s22  ;;  %s33_s23 = int_to_ptr.hbm [resolvable:$true] %s32_s23 }
   0x4   :  { %s18_s26 = sshll.u32 %s386_s1, 4  ;;  %s222_s27 = sshra.s32 %s33_s23, 4  ;;  %s223_s27 = int_to_ptr.hbm [resolvable:$true] %s222_s27  ;;  %s19_s26 = int_to_ptr.hbm [resolvable:$true] %s18_s26 }
   0x5   :  { %s224_s28 = scalar_lea.hbm %s223_s27, 64  ;;  %s226_s5 = scalar_lea.hbm %s387_s2, 256 }
   0x6   :  { %p225_p0 = scmp.ne.s32.totalorder %s223_s27, %s224_s28  ;;  %p227_p1 = scmp.lt.s32.totalorder %s223_s27, %s387_s2 }
   0x7   :  { %p228_p2 = scmp.lt.s32.totalorder %s226_s5, %s224_s28 }
   0x9   :  { %p229_p3 = por %p228_p2, %p227_p1 }
   0xb   :  { %p230_p4 = pnand %p229_p3, %p225_p0 }
   0xd   :  { %233 = shalt.err (!%p230_p4)
}
   0xe   :  { %s325_s8 = smov 64   ;;  %s326_s9 = smov 4  }
   0xf   :  { %40 = dma.hbm_to_vmem [thread:$0]  %s33_s23, 1024, %s35_s22, [#allocation8], %s325_s8, %s325_s8, %s326_s9  }
  0x10   :  { %s327_s1 = smov [#allocation4]   ;;  %s46_s15 = scalar_lea.hbm %s388_s3, %s385_s0 }
  0x11   :  { %s20_s10 = sshll.u32 %s327_s1, 4  ;;  %s48_s16 = sshll.u32 %s46_s15, 4  ;;  %s21_s10 = int_to_ptr.vmem [resolvable:$true] %s20_s10  ;;  %s49_s16 = int_to_ptr.hbm [resolvable:$true] %s48_s16 }
  0x12   :  { %23 = dma.hbm_to_vmem [thread:$0]  %s19_s26, 64, %s21_s10, [#allocation5]  }
  0x13   :  { %s328_s2 = smov [#allocation9]   ;;  %s270_s18 = sshra.s32 %s49_s16, 4  ;;  %s271_s18 = int_to_ptr.hbm [resolvable:$true] %s270_s18 }
  0x14   :  { %s50_s17 = sshll.u32 %s328_s2, 4  ;;  %s272_s19 = scalar_lea.hbm %s271_s18, 1  ;;  %s51_s17 = int_to_ptr.vmem [resolvable:$true] %s50_s17 }
  0x15   :  { %p273_p5 = scmp.ne.s32.totalorder %s271_s18, %s272_s19  ;;  %s274_s22 = scalar_lea.hbm %s388_s3, 4 }
  0x16   :  { %p275_p6 = scmp.lt.s32.totalorder %s271_s18, %s388_s3  ;;  %p276_p7 = scmp.lt.s32.totalorder %s274_s22, %s272_s19 }
  0x18   :  { %p277_p8 = por %p276_p7, %p275_p6 }
  0x1a   :  { %p278_p9 = pnand %p277_p8, %p273_p5 }
  0x1c   :  { %281 = shalt.err (!%p278_p9)
}
  0x1d   :  { %53 = dma.hbm_to_vmem [thread:$0]  %s49_s16, 16, %s51_s17, [#allocation8]  }
  0x1e   :  { %318 = dma.done.wait [#allocation5], 64  }
  0x1f   :  { %319 = vsyncadd [#allocation5], 4294967232 }
  0x20   :  { %320 = dma.done.wait [#allocation8], 1040  }
  0x21   :  { %321 = vsyncadd [#allocation8], 4294966256  ;;  %v214_v0 = vld [vmem:[#allocation7 + $0x38] sm:$0xff]  ;;  %v213_v1 = vld [vmem:[#allocation7 + $0x30] sm:$0xff]  ;;  %s329_s0 = smov [#allocation10]   ;;  %s158_s27 = sshll.u32 %s389_s4, 4  ;;  %s159_s27 = int_to_ptr.hbm [resolvable:$true] %s158_s27 }
  0x22   :  { %137 = vmatpush.bf16.msra.mxu0 %v214_v0  ;;  %v212_v2 = vld [vmem:[#allocation7 + $0x28] sm:$0xff]  ;;  %v211_v3 = vld [vmem:[#allocation7 + $0x20] sm:$0xff]  ;;  %v210_v4 = vld [vmem:[#allocation7 + $0x18] sm:$0xff]  ;;  %s156_s3 = sshll.u32 %s329_s0, 4  ;;  %s157_s3 = int_to_ptr.vmem [resolvable:$true] %s156_s3 }
  0x23   :  { %v209_v5 = vld [vmem:[#allocation7 + $0x10] sm:$0xff]  ;;  %v208_v6 = vld [vmem:[#allocation7 + $0x8] sm:$0xff]  ;;  %v207_v7 = vld [vmem:[#allocation7] sm:$0xff] }
  0x24   :  { %v68_v8 = vld [vmem:[#allocation4] sm:$0xf]  ;;  %v221_v9 = vld [vmem:[#allocation9] ss:$0 sm:$0xff] }
  0x26   :  { %138 = vmatpush.bf16.msra.mxu0 %v213_v1 }
  0x2a   :  { %139 = vmatpush.bf16.msra.mxu0 %v212_v2 }
  0x2e   :  { %140 = vmatpush.bf16.msra.mxu0 %v211_v3 }
  0x32   :  { %141 = vmatpush.bf16.msra.mxu0 %v210_v4 }
  0x36   :  { %142 = vmatpush.bf16.msra.mxu0 %v209_v5 }
  0x3a   :  { %143 = vmatpush.bf16.msra.mxu0 %v208_v6 }
  0x3e   :  { %144 = vmatpush.bf16.msra.mxu0 %v207_v7 }
  0x41   :  { %145 = vmatmul.bf16.vlgmr.msra.gmra.mxu0 %v68_v8 }
  0xbe   :  { %v146_v10 = vpop.f32.mrf.mxu0 }
  0xbf   :  { %v147_v11 = vadd.f32 %v221_v9, %v146_v10 }
  0xc1   :  { %150 = vst [vmem:[#allocation10] sm:$0xff] %v147_v11 }
  0xc2   :  { %161 = dma.vmem_to_hbm [thread:$0]  %s157_s3, 128, %s159_s27, [#allocation6]  }
  0xc6   :  { %v148_v12 = vpop.f32.mrf.mxu0 }
  0xc7   :  { %322 = dma.done.wait [#allocation6], 128  }
  0xc8   :  { %323 = vsyncadd [#allocation6], 4294967168 }
  0xc9   :  { %166 = vsyncpa [#allocation5], 1 }
  0xca   :  { %167 = vsyncpa [#allocation8], 1 }
  0xcb   :  { %168 = vsyncpa [#allocation6], 1 }

</bundles_post_ra>
